<compile_context>
chip_gen: v7x
topology: tpu7x:2x2x1
jax: 0.10.0
libtpu: 0.0.40
codegen_flags: <defaults>
</compile_context>

<pallas_src>
import functools

import jax
import jax.numpy as jnp
from jax.experimental import pallas as pl
from jax.experimental.pallas import tpu as pltpu


_TINY_FLOPS_THRESHOLD = 1 << 20          # M*K*N below this -> plain jnp fast path
_WEIGHT_RESIDENT_BYTES = 6 * 1024 * 1024  # full-N weight panel budget
_TILE_VMEM_BUDGET = 40 * 1024 * 1024      # working budget for the tile plan
_VMEM_LIMIT_CAP = 48 * 1024 * 1024        # safe on v7x (64 MiB physical VMEM)


def _round_up(x: int, m: int) -> int:
    return ((x + m - 1) // m) * m


def _mlp_kernel(x_ref, w_ref, b_ref, o_ref):
    # x_ref: (tm, K)   activations (stored dtype, e.g. f32)
    # w_ref: (K, tn)   weight in the compute dtype (bf16 on v6e/v7x for MXU peak)
    # b_ref: (1, tn)   bias, f32
    # o_ref: (tm, tn)  output
    x = x_ref[...]
    w = w_ref[...]
    if x.dtype != w.dtype:
        # In-kernel cast to the MXU compute dtype: VPU work hidden under the matmul,
        # avoids an extra HBM round trip over the activation tensor in the wrapper.
        x = x.astype(w.dtype)
    acc = jnp.dot(x, w, preferred_element_type=jnp.float32)
    o_ref[...] = jnp.tanh(acc + b_ref[...]).astype(o_ref.dtype)


def _choose_tiles(M, K, N, x_bytes, w_bytes, out_bytes):
    sub = 16 if x_bytes == 2 else 8  # sublane granularity of the stored activation dtype

    # N tiling: keep the whole weight resident along N when it fits a modest budget
    # (true for all realistic MLPLayer hidden sizes); otherwise 128-aligned panels.
    if K * N * w_bytes <= _WEIGHT_RESIDENT_BYTES:
        tn = N
    else:
        tn = 512 if N % 512 == 0 else 256
        tn = min(tn, _round_up(N, 128))

    # M tiling: biggest tile that fits the budget (fewer grid steps, better pipelining).
    tm = min(512, _round_up(M, sub))

    def vmem_need(tm_, tn_):
        # double-buffered inputs/bias/output tiles
        return 2 * (tm_ * K * x_bytes + K * tn_ * w_bytes + tn_ * 4 + tm_ * tn_ * out_bytes)

    while vmem_need(tm, tn) > _TILE_VMEM_BUDGET and tm > 64:
        tm = max(64, _round_up(tm // 2, sub))

    # v7x megacore: guarantee >=2 blocks along a parallel axis when the shape allows it,
    # so a (1, 1) grid doesn't idle one of the two TensorCores.
    if pl.cdiv(M, tm) == 1 and pl.cdiv(N, tn) == 1 and M > sub:
        tm = max(sub, _round_up(pl.cdiv(M, 2), sub))

    return tm, tn, vmem_need(tm, tn)


@functools.partial(jax.jit, static_argnames=("compute_dtype",))
def mlp_layer(features, weight_kn, bias, *, compute_dtype=None):
    """tanh(features @ weight_kn + bias) as a weight-resident Pallas TPU matmul.

    compute_dtype: optional MXU input dtype (e.g. jnp.bfloat16 for v6e/v7x peak).
    Accumulation and the bias/tanh epilogue are always f32.
    """
    orig_shape = features.shape
    K = orig_shape[-1]
    N = weight_kn.shape[1]
    out_dtype = features.dtype

    x2d = features.reshape(-1, K)
    M = x2d.shape[0]

    # Weight converted once (cheap, outside the hot per-tile path); activations are cast
    # per-tile inside the kernel instead of in the wrapper.
    w = weight_kn if compute_dtype is None else weight_kn.astype(compute_dtype)
    b2d = bias.astype(jnp.float32).reshape(1, N)

    # Tiny-problem fast path: pallas_call fixed costs dominate sub-microsecond problems.
    if M * K * N <= _TINY_FLOPS_THRESHOLD:
        x = x2d if x2d.dtype == w.dtype else x2d.astype(w.dtype)
        out = jnp.tanh(
            jnp.dot(x, w, preferred_element_type=jnp.float32) + b2d
        ).astype(out_dtype)
        return out.reshape(orig_shape[:-1] + (N,))

    x_bytes = jnp.dtype(x2d.dtype).itemsize
    w_bytes = jnp.dtype(w.dtype).itemsize
    out_bytes = jnp.dtype(out_dtype).itemsize

    tm, tn, vmem_need = _choose_tiles(M, K, N, x_bytes, w_bytes, out_bytes)
    grid = (pl.cdiv(M, tm), pl.cdiv(N, tn))
    m_blocks, n_blocks = grid

    vmem_limit = int(
        min(_VMEM_LIMIT_CAP, max(vmem_need + (4 << 20), 32 << 20))
    )

    cost = pl.CostEstimate(
        flops=2 * M * K * N,
        transcendentals=M * N,
        bytes_accessed=(
            M * K * x_bytes
            + K * N * w_bytes * (m_blocks if n_blocks > 1 else 1)  # weight re-streamed only if N is tiled
            + M * N * out_bytes
            + N * 4
        ),
    )

    out = pl.pallas_call(
        _mlp_kernel,
        out_shape=jax.ShapeDtypeStruct((M, N), out_dtype),
        grid=grid,
        in_specs=[
            pl.BlockSpec((tm, K), lambda i, j: (i, 0)),   # activations: one HBM pass
            pl.BlockSpec((K, tn), lambda i, j: (0, j)),   # weight: VMEM-resident when n_blocks == 1
            pl.BlockSpec((1, tn), lambda i, j: (0, j)),   # bias (f32)
        ],
        out_specs=pl.BlockSpec((tm, tn), lambda i, j: (i, j)),
        compiler_params=pltpu.CompilerParams(
            dimension_semantics=("parallel", "parallel"),
            vmem_limit_bytes=vmem_limit,
        ),
        cost_estimate=cost,
    )(x2d, w, b2d)

    return out.reshape(orig_shape[:-1] + (N,))


def init_mlp_params(key, input_size, output_size, dtype=jnp.float32):
    # Mimic torch nn.Linear default init: U(-1/sqrt(in), 1/sqrt(in)).
    kw, kb = jax.random.split(key)
    bound = 1.0 / (input_size ** 0.5)
    # Stored directly as [K, N] for the kernel (== torch weight.T).
    weight_kn = jax.random.uniform(
        kw, (input_size, output_size), dtype=dtype, minval=-bound, maxval=bound
    )
    bias = jax.random.uniform(
        kb, (output_size,), dtype=dtype, minval=-bound, maxval=bound
    )
    return weight_kn, bias


if __name__ == "__main__":
    key = jax.random.PRNGKey(0)
    k_x, k_p, k_odd = jax.random.split(key, 3)

    # Small shapes consistent with the module (features [..., input_size]); large
    # enough to exercise the Pallas path (not the tiny-problem fast path).
    batch, seq, input_size, output_size = 4, 16, 256, 256
    features = jax.random.normal(k_x, (batch, seq, input_size), dtype=jnp.float32)
    weight_kn, bias = init_mlp_params(k_p, input_size, output_size)

    # f32 compute path.
    out = jax.block_until_ready(mlp_layer(features, weight_kn, bias))
    ref = jnp.tanh(features @ weight_kn + bias)
    assert out.shape == (batch, seq, output_size)
    assert jnp.allclose(out, ref, atol=1e-4, rtol=1e-4)

    # bf16 MXU path (recommended default on v6e/v7x) — relaxed tolerances, numerics
    # change is expected.
    out_bf16 = jax.block_until_ready(
        mlp_layer(features, weight_kn, bias, compute_dtype=jnp.bfloat16)
    )
    assert jnp.allclose(out_bf16, ref, atol=3e-2, rtol=3e-2)

    # Ragged M (no padding copy; relies on Pallas partial-block handling).
    features_odd = jax.random.normal(k_odd, (139, input_size), dtype=jnp.float32)
    out_odd = jax.block_until_ready(mlp_layer(features_odd, weight_kn, bias))
    ref_odd = jnp.tanh(features_odd @ weight_kn + bias)
    assert jnp.allclose(out_odd, ref_odd, atol=1e-4, rtol=1e-4)

    # Tiny-problem fast path.
    w_tiny, b_tiny = init_mlp_params(k_p, 32, 16)
    x_tiny = jax.random.normal(k_x, (2, 8, 32), dtype=jnp.float32)
    out_tiny = jax.block_until_ready(mlp_layer(x_tiny, w_tiny, b_tiny))
    ref_tiny = jnp.tanh(x_tiny @ w_tiny + b_tiny)
    assert jnp.allclose(out_tiny, ref_tiny, atol=1e-5, rtol=1e-5)

    print("KERNEL_OK")
</pallas_src>

<mosaic_0001>
module attributes {stable_mosaic.version = 11 : i64} {
  func.func @_mlp_kernel(%arg0: i32, %arg1: i32, %arg2: memref<32x256xf32, #tpu.memory_space<vmem>>, %arg3: memref<256x256xf32, #tpu.memory_space<vmem>>, %arg4: memref<1x256xf32, #tpu.memory_space<vmem>>, %arg5: memref<32x256xf32, #tpu.memory_space<vmem>>) attributes {dimension_semantics = [#tpu.dimension_semantics<parallel>, #tpu.dimension_semantics<parallel>], iteration_bounds = array<i64: 2, 1>, scalar_prefetch = 0 : i64, scratch_operands = 0 : i64, tpu.core_type = #tpu.core_type<tc>, window_params = [{transform_indices = @transform_0, window_bounds = array<i64: 32, 256>}, {transform_indices = @transform_1, window_bounds = array<i64: 256, 256>}, {transform_indices = @transform_2, window_bounds = array<i64: 1, 256>}, {transform_indices = @transform_3, window_bounds = array<i64: 32, 256>}]} {
    %c0 = arith.constant 0 : index
    %c0_0 = arith.constant 0 : index
    %0 = vector.load %arg2[%c0, %c0_0] : memref<32x256xf32, #tpu.memory_space<vmem>>, vector<32x256xf32>
    %c0_1 = arith.constant 0 : index
    %c0_2 = arith.constant 0 : index
    %1 = vector.load %arg3[%c0_1, %c0_2] : memref<256x256xf32, #tpu.memory_space<vmem>>, vector<256x256xf32>
    %cst = arith.constant dense<0.000000e+00> : vector<32x256xf32>
    %2 = tpu.matmul %0, %1, %cst {dimension_numbers = #tpu.dot_dimension_numbers<[1], [0], [0], [1], [0, 0, 1, 1], [], []>} : vector<32x256xf32>, vector<256x256xf32>, vector<32x256xf32> -> vector<32x256xf32>
    %c0_3 = arith.constant 0 : index
    %c0_4 = arith.constant 0 : index
    %3 = vector.load %arg4[%c0_3, %c0_4] : memref<1x256xf32, #tpu.memory_space<vmem>>, vector<1x256xf32>
    %4 = vector.broadcast %3 : vector<1x256xf32> to vector<32x256xf32>
    %5 = arith.addf %2, %4 : vector<32x256xf32>
    %6 = math.tanh %5 : vector<32x256xf32>
    %c0_5 = arith.constant 0 : index
    %c0_6 = arith.constant 0 : index
    %7 = vector.load %arg5[%c0_5, %c0_6] : memref<32x256xf32, #tpu.memory_space<vmem>>, vector<32x256xf32>
    tpu.vector_store %arg5[%c0_5, %c0_6], %6 {strides = array<i32>} : memref<32x256xf32, #tpu.memory_space<vmem>>, vector<32x256xf32>,
    return
  }
  func.func @transform_0(%arg0: i32, %arg1: i32) -> (i32, i32) {
    %c0_i32 = arith.constant 0 : i32
    %c0_i32_0 = arith.constant 0 : i32
    return %arg0, %c0_i32 : i32, i32
  }
  func.func @transform_1(%arg0: i32, %arg1: i32) -> (i32, i32) {
    %c0_i32 = arith.constant 0 : i32
    %c0_i32_0 = arith.constant 0 : i32
    return %c0_i32, %arg1 : i32, i32
  }
  func.func @transform_2(%arg0: i32, %arg1: i32) -> (i32, i32) {
    %c0_i32 = arith.constant 0 : i32
    %c0_i32_0 = arith.constant 0 : i32
    return %c0_i32, %arg1 : i32, i32
  }
  func.func @transform_3(%arg0: i32, %arg1: i32) -> (i32, i32) {
    %c0_i32 = arith.constant 0 : i32
    return %arg0, %arg1 : i32, i32
  }
}

</mosaic_0001>

<bundles_post_ra>
// kernel: mlp_layer.1
= control target key start
LH: loop header
LB: loop body
LE: loop exit
PB: predicated region body
PF: predicated region fallthrough
CT: control target
= control target key end

     0   :  { %8 = vsyncpa [#allocation3], 0  ;;  %s1192_s0 = inlined_call_operand.hbm [shape: f32[64,256], index: 0, kind: input, shape index: {}]   ;;  %s1193_s1 = inlined_call_operand.hbm [shape: f32[256,256], index: 1, kind: input, shape index: {}]   ;;  %s1194_s2 = inlined_call_operand.vmem [shape: f32[1,256], index: 2, kind: input, shape index: {}]   ;;  %s1195_s3 = inlined_call_operand.hbm [shape: f32[64,256], index: 3, kind: output, shape index: {}]  }
   0x1   :  { %10 = vsyncpa [#allocation3 + $0x1], 0 }
   0x2   :  { %11 = vsyncpa [#allocation6], 0 }
   0x3   :  { %12 = vsyncpa [#allocation4], 0 }
   0x4   :  { %14 = vsyncpa [#allocation4 + $0x1], 0  ;;  %s950_s12 = smov 0   ;;  %s952_s13 = smov 0  }
   0x5   :  { %s954_s14 = smov 0   ;;  %s956_s15 = smov 0  }
   0x6   :  { %s958_s16 = smov 0   ;;  %s960_s17 = smov 0  }
   0x7 LB: > { %s564_s18 = sadd.s32 4294967295, %s921_s17   ;;  %s565_s19 = sadd.s32 4294967294, %s921_s17   ;;  %s921_s17 = sphi %s960_s17, %s20_s17   ;;  %s917_s16 = sphi %s958_s16, %s1219_s16   ;;  %s913_s15 = sphi %s956_s15, %s1218_s15   ;;  %s909_s14 = sphi %s954_s14, %s1217_s14   ;;  %s905_s13 = sphi %s952_s13, %s1216_s13   ;;  %s901_s12 = sphi %s950_s12, %s1215_s12  }
   0x8   : > { %p52_p0 = scmp.ne.s32.totalorder %s905_s13, %s901_s12  ;;  %p984_p1 = scmp.eq.s32.totalorder %s564_s18, 0 }
   0x9   : > { %p988_p2 = scmp.eq.s32.totalorder %s564_s18, 1  ;;  %p136_p3 = scmp.eq.s32.totalorder %s565_s19, 1 }
   0xa   : > { %s1200_s20 = scalar_select %p984_p1, 1, 0 }
   0xb   : > { %s1201_s21 = scalar_select %p988_p2, 1, 0 }
   0xc   : > { %p994_p4 = por %p984_p1, %p52_p0  ;;  %p566_p5 = scmp.ge.s32.totalorder %s921_s17, 1 }
   0xd   : > { %p999_p6 = por %p136_p3, %p52_p0  ;;  %p143_p7 = scmp.lt.s32.totalorder %s921_s17, 3 }
   0xe   : > { %s1202_s22 = scalar_select %p994_p4, 1, 0 }
   0xf   : > { %s1203_s23 = scalar_select %p999_p6, 1, 0 }
  0x10   : > { %p1004_p8 = pnand %p566_p5, %p143_p7  ;;  %s923_s25 = smov [#allocation5]  }
  0x11   : > { %s158_s26 = sshll.u32 %s923_s25, 4  ;;  %s32_s28 = sadd.s32 1, %s917_s16  ;;  %s159_s26 = int_to_ptr.vmem [resolvable:$true] %s158_s26 }
  0x12   : > { %s1204_s24 = scalar_select %p1004_p8, 1, 0 }
  0x13   : > { %p692_p9 = pneg %p1004_p8  ;;  %s777_s4 = scalar_lea.hbm %s1193_s1, 8192 }
  0x14   : > { %p778_p12 = scmp.ne.s32.totalorder %s1193_s1, %s777_s4  ;;  %p784_p5 = scmp.lt.u32.totalorder %s777_s4, %s1193_s1 }
  0x15   : > { %p1013_p11 = pnand %p692_p9, %p984_p1 }
  0x17   : > { %p779_p13 = pneg %p1013_p11 }
  0x19   : > { %p780_p0 = pnand %p779_p13, %p778_p12 }
  0x1b   : > { %p781_p3 = pneg %p780_p0 }
  0x1d   : > { %p786_p7 = pnand %p784_p5, %p781_p3 }
  0x1f   : > { %789 = shalt.err (!%p786_p7)
}
  0x20   : > { %s790_s9 = scalar_lea.vmem %s159_s26, 8192  ;;  %p798_p1 = scmp.lt.s32.totalorder %s159_s26, %s159_s26 }
  0x21   : > { %p791_p9 = scmp.ne.s32.totalorder %s159_s26, %s790_s9  ;;  %p799_p4 = scmp.lt.s32.totalorder %s790_s9, %s790_s9 }
  0x23   : > { %p793_p10 = pnand %p791_p9, %p779_p13  ;;  %p800_p8 = por %p799_p4, %p798_p1 }
  0x25   : > { %p794_p6 = pneg %p793_p10 }
  0x27   : > { %p801_p2 = pnand %p800_p8, %p794_p6 }
  0x29   : > { %804 = shalt.err (!%p801_p2)
}
  0x2a   : > { %s924_s10 = smov 256   ;;  %s925_s11 = smov 16  }
  0x2b   : > { %695 = dma.hbm_to_vmem [thread:$0]  (!%p1013_p11), %s1193_s1, 8192, %s159_s26, [#allocation6], %s924_s10, %s924_s10, %s925_s11  }
  0x2c   : > { %p34_p1 = scmp.ge.s32.totalorder %s32_s28, 2  ;;  %s39_s25 = sadd.s32 1, %s909_s14 }
  0x2d   : > { %p46_p2 = scmp.ne.s32.totalorder %s909_s14, %s905_s13  ;;  %p47_p4 = scmp.eq.s32.totalorder %s921_s17, 0 }
  0x2e   : > { %s1221_s28 = smov (%p34_p1, %s32_s28), 0  ;;  %p1207_p8 = scmp.ne.s32.totalorder %s1201_s21, 0 }
  0x2f   : > { %p1043_p6 = por %p47_p4, %p46_p2  ;;  %s36_s30 = ssub.s32 %s917_s16, %s1221_s28 }
  0x30   : > { %p1049_p10 = por %p1207_p8, %p46_p2  ;;  %p705_p12 = scmp.lt.s32.totalorder %s921_s17, 2 }
  0x31   : > { %p37_p11 = scmp.eq.s32.totalorder %s36_s30, 0  ;;  %s180_s26 = sand.u32 1, %s909_s14  }
  0x32   : > { %s570_s4 = sshll.u32 %s180_s26, 6  ;;  %s585_s6 = sshll.u32 %s917_s16, 10 }
  0x33   : > { %s1058_s5 = scalar_select %p37_p11, %s909_s14, %s39_s25  }
  0x34   : > { %s1064_s9 = scalar_lea.hbm %s1192_s0, %s585_s6  ;;  %s184_s21 = scalar_lea.vmem [#allocation2], %s570_s4 }
  0x35   : > { %s192_s18 = sshll.u32 %s184_s21, 4  ;;  %p1070_p13 = pnand %p705_p12, %p1043_p6  ;;  %s1066_s18 = int_to_ptr.vmem [resolvable:$true] %s192_s18 }
  0x36   : > { %s1074_s25 = scalar_lea.sflag [#allocation3], %s180_s26  ;;  %s805_s30 = scalar_lea.hbm %s1064_s9, 1024 }
  0x37   : > { %p806_p0 = scmp.ne.s32.totalorder %s1064_s9, %s805_s30  ;;  %p807_p3 = pneg %p1070_p13 }
  0x38   : > { %s810_s29 = scalar_lea.hbm %s1192_s0, 2048  ;;  %p811_p9 = scmp.lt.u32.totalorder %s1064_s9, %s1192_s0 }
  0x39   : > { %p808_p5 = pnand %p807_p3, %p806_p0  ;;  %p812_p1 = scmp.lt.u32.totalorder %s810_s29, %s805_s30 }
  0x3a   : > { %p814_p4 = scmp.lt.u32.totalorder %s805_s30, %s1064_s9 }
  0x3b   : > { %p809_p7 = pneg %p808_p5  ;;  %p813_p2 = por %p812_p1, %p811_p9 }
  0x3d   : > { %p815_p6 = por %p814_p4, %p813_p2 }
  0x3f   : > { %p816_p8 = pnand %p815_p6, %p809_p7 }
  0x41   : > { %819 = shalt.err (!%p816_p8)
}
  0x42   : > { %s820_s26 = scalar_lea.vmem %s1066_s18, 1024  ;;  %s926_s21 = smov [#allocation2]  }
  0x43   : > { %p821_p12 = scmp.ne.s32.totalorder %s1066_s18, %s820_s26  ;;  %s825_s4 = sshll.u32 %s926_s21, 4  ;;  %s826_s4 = int_to_ptr.vmem [resolvable:$false] %s825_s4 }
  0x44   : > { %s827_s6 = scalar_lea.vmem %s826_s4, 2048  ;;  %p828_p5 = scmp.lt.s32.totalorder %s1066_s18, %s826_s4 }
  0x45   : > { %p823_p11 = pnand %p821_p12, %p807_p3  ;;  %p829_p9 = scmp.lt.s32.totalorder %s827_s6, %s820_s26 }
  0x47   : > { %p824_p0 = pneg %p823_p11  ;;  %p830_p1 = por %p829_p9, %p828_p5 }
  0x49   : > { %p831_p2 = pnand %p830_p1, %p824_p0 }
  0x4b   : > { %834 = shalt.err (!%p831_p2)
}
  0x4c   : > { %699 = dma.hbm_to_vmem [thread:$0]  (!%p1070_p13), %s1064_s9, 1024, %s1066_s18, %s1074_s25, %s924_s10, %s924_s10, %s925_s11  }
  0x4d   : > { %p1210_p3 = scmp.ne.s32.totalorder %s1204_s24, 0 }
  0x4e   : > { %s1108_s30 = sand.u32 (!%p1210_p3), 1, %s905_s13   ;;  %p1211_p7 = scmp.ne.s32.totalorder (!%p1210_p3), %s1202_s22, 0 }
  0x4f   : > { %204 = sbr.rel (%p1210_p3) target bundleno = 404 (0x194), region = 32  ;;  %s575_s29 = sshll.u32 (!%p1210_p3), %s1108_s30, 6 }
  0x50   : > { %s207_s7 = scalar_lea.sflag (!%p1210_p3), [#allocation3], %s1108_s30  ;;  %s1114_s19 = scalar_lea.vmem (!%p1210_p3), [#allocation2], %s575_s29 }
  0x56   : > { %888 = dma.done.wait (%p1211_p7), %s207_s7, 1024  }
  0x57   : > { %890 = vsyncadd (%p1211_p7), %s207_s7, 4294966272  ;;  %p1212_p13 = scmp.ne.s32.totalorder %s1200_s20, 0 }
  0x59   : > { %892 = dma.done.wait (%p1212_p13), [#allocation6], 8192  }
  0x5a   : > { %894 = vsyncadd (%p1212_p13), [#allocation6], 4294959104  ;;  %v259_v0 = vld [vmem:[#allocation5 + $0x8] sm:$0xff]  ;;  %v261_v1 = vld [vmem:[#allocation5 + $0x18] sm:$0xff]  ;;  %s240_s24 = scalar_lea.vmem [#allocation7], %s575_s29  ;;  %s587_s10 = sshll.u32 %s913_s15, 10 }
  0x5b   : > { %v258_v2 = vld [vmem:[#allocation5] sm:$0xff]  ;;  %v588_v3 = vpack.c.bf16 %v261_v1, %v259_v0  ;;  %v260_v4 = vld [vmem:[#allocation5 + $0x10] sm:$0xff]  ;;  %v263_v5 = vld [vmem:[#allocation5 + $0x28] sm:$0xff]  ;;  %s456_s11 = sshll.u32 %s240_s24, 4  ;;  %s1141_s25 = scalar_lea.hbm %s1195_s3, %s587_s10  ;;  %s1143_s11 = int_to_ptr.vmem [resolvable:$true] %s456_s11 }
  0x5c   : > { %v265_v6 = vld [vmem:[#allocation5 + $0x38] sm:$0xff]  ;;  %v590_v7 = vpack.c.bf16 %v260_v4, %v258_v2  ;;  %v262_v9 = vld [vmem:[#allocation5 + $0x20] sm:$0xff]  ;;  %v264_v10 = vld [vmem:[#allocation5 + $0x30] sm:$0xff]  ;;  %s440_s15 = scalar_lea.sflag [#allocation4], %s1108_s30  ;;  %s835_s8 = scalar_lea.vmem %s1143_s11, 1024 }
  0x5d   : > { %v592_v8 = vpack.c.bf16 %v265_v6, %v263_v5  ;;  %v267_v11 = vld [vmem:[#allocation5 + $0x48] sm:$0xff]  ;;  %589 = vmatprep.subr.bf16.mxu0 %v588_v3  ;;  %652 = vmatprep.subr.bf16.mxu1 %v588_v3  ;;  %v269_v12 = vld [vmem:[#allocation5 + $0x58] sm:$0xff]  ;;  %v594_v13 = vpack.c.bf16 %v264_v10, %v262_v9  ;;  %v266_v15 = vld [vmem:[#allocation5 + $0x40] sm:$0xff]  ;;  %p836_p4 = scmp.ne.s32.totalorder %s1143_s11, %s835_s8  ;;  %s927_s26 = smov [#allocation7]  }
  0x5e   : > { %591 = vmatpush1.bf16.msra.mxu0 %v590_v7  ;;  %668 = vmatpush1.bf16.msra.mxu1 %v590_v7  ;;  %v596_v14 = vpack.c.bf16 %v269_v12, %v267_v11  ;;  %v268_v16 = vld [vmem:[#allocation5 + $0x50] sm:$0xff]  ;;  %v271_v17 = vld [vmem:[#allocation5 + $0x68] sm:$0xff]  ;;  %v273_v18 = vld [vmem:[#allocation5 + $0x78] sm:$0xff]  ;;  %s839_s21 = sshll.u32 %s927_s26, 4  ;;  %s840_s21 = int_to_ptr.vmem [resolvable:$false] %s839_s21 }
  0x5f   : > { %593 = vmatprep.subr.bf16.mxu0 %v592_v8  ;;  %653 = vmatprep.subr.bf16.mxu1 %v592_v8  ;;  %v598_v19 = vpack.c.bf16 %v268_v16, %v266_v15  ;;  %v600_v20 = vpack.c.bf16 %v273_v18, %v271_v17  ;;  %v270_v21 = vld [vmem:[#allocation5 + $0x60] sm:$0xff]  ;;  %v272_v22 = vld [vmem:[#allocation5 + $0x70] sm:$0xff]  ;;  %v275_v23 = vld [vmem:[#allocation5 + $0x88] sm:$0xff]  ;;  %p837_p6 = pnand %p836_p4, %p1049_p10  ;;  %s841_s4 = scalar_lea.vmem %s840_s21, 2048 }
  0x60   : > { %v277_v24 = vld [vmem:[#allocation5 + $0x98] sm:$0xff]  ;;  %v602_v25 = vpack.c.bf16 %v272_v22, %v270_v21  ;;  %v274_v27 = vld [vmem:[#allocation5 + $0x80] sm:$0xff]  ;;  %v276_v28 = vld [vmem:[#allocation5 + $0x90] sm:$0xff]  ;;  %p842_p12 = scmp.lt.s32.totalorder %s1143_s11, %s840_s21  ;;  %p843_p11 = scmp.lt.s32.totalorder %s841_s4, %s835_s8 }
  0x61   : > { %v604_v26 = vpack.c.bf16 %v277_v24, %v275_v23  ;;  %v279_v29 = vld [vmem:[#allocation5 + $0xa8] sm:$0xff]  ;;  %v281_v30 = vld [vmem:[#allocation5 + $0xb8] sm:$0xff]  ;;  %v606_v31 = vpack.c.bf16 %v276_v28, %v274_v27  ;;  %v278_v33 = vld [vmem:[#allocation5 + $0xa0] sm:$0xff]  ;;  %p838_p8 = pneg %p837_p6 }
  0x62   : > { %595 = vmatpush1.bf16.msra.mxu0 %v594_v13  ;;  %669 = vmatpush1.bf16.msra.mxu1 %v594_v13  ;;  %v608_v32 = vpack.c.bf16 %v281_v30, %v279_v29  ;;  %v280_v34 = vld [vmem:[#allocation5 + $0xb0] sm:$0xff]  ;;  %v283_v35 = vld [vmem:[#allocation5 + $0xc8] sm:$0xff]  ;;  %v285_v36 = vld [vmem:[#allocation5 + $0xd8] sm:$0xff]  ;;  %p844_p0 = por %p843_p11, %p842_p12 }
  0x63   : > { %597 = vmatprep.subr.bf16.mxu0 %v596_v14  ;;  %654 = vmatprep.subr.bf16.mxu1 %v596_v14  ;;  %v610_v37 = vpack.c.bf16 %v280_v34, %v278_v33  ;;  %v282_v38 = vld [vmem:[#allocation5 + $0xc0] sm:$0xff]  ;;  %v612_v39 = vpack.c.bf16 %v285_v36, %v283_v35  ;;  %v284_v40 = vld [vmem:[#allocation5 + $0xd0] sm:$0xff]  ;;  %v251_v41 = vld [vmem:[%s1114_s19 + $0x8] sm:$0xff] }
  0x64   : > { %v255_v42 = vld [vmem:[%s1114_s19 + $0x28] sm:$0xff]  ;;  %v289_v44 = vld [vmem:[#allocation5 + $0xf8] sm:$0xff]  ;;  %398 = vmatprep.mubr.f32.mxu0 %v251_v41  ;;  %v614_v45 = vpack.c.bf16 %v284_v40, %v282_v38  ;;  %v286_v47 = vld [vmem:[#allocation5 + $0xe0] sm:$0xff]  ;;  %v324_v40 = vlaneseq  ;;  %p845_p5 = pnand %p844_p0, %p838_p8 }
  0x65   : > { %v287_v43 = vld [vmem:[#allocation5 + $0xe8] sm:$0xff]  ;;  %410 = vmatprep.mubr.f32.mxu1 %v255_v42  ;;  %v288_v48 = vld [vmem:[#allocation5 + $0xf0] sm:$0xff]  ;;  %v293_v50 = vld [vmem:[#allocation5 + $0x118] sm:$0xff] }
  0x66   : > { %599 = vmatpush1.bf16.msra.mxu0 %v598_v19  ;;  %670 = vmatpush1.bf16.msra.mxu1 %v598_v19  ;;  %v616_v46 = vpack.c.bf16 %v289_v44, %v287_v43  ;;  %v291_v49 = vld [vmem:[#allocation5 + $0x108] sm:$0xff]  ;;  %v618_v51 = vpack.c.bf16 %v288_v48, %v286_v47  ;;  %v290_v53 = vld [vmem:[#allocation5 + $0x100] sm:$0xff]  ;;  %v292_v54 = vld [vmem:[#allocation5 + $0x110] sm:$0xff]  ;;  %v325_v41 = vshrl.u32 %v324_v40, 7 }
  0x67   : > { %601 = vmatprep.subr.bf16.mxu0 %v600_v20  ;;  %655 = vmatprep.subr.bf16.mxu1 %v600_v20  ;;  %v620_v52 = vpack.c.bf16 %v293_v50, %v291_v49  ;;  %v295_v55 = vld [vmem:[#allocation5 + $0x128] sm:$0xff]  ;;  %v297_v56 = vld [vmem:[#allocation5 + $0x138] sm:$0xff]  ;;  %v622_v57 = vpack.c.bf16 %v292_v54, %v290_v53  ;;  %v294_v59 = vld [vmem:[#allocation5 + $0x120] sm:$0xff] }
  0x68   : > { %v624_v58 = vpack.c.bf16 %v297_v56, %v295_v55  ;;  %v296_v60 = vld [vmem:[#allocation5 + $0x130] sm:$0xff]  ;;  %v299_v61 = vld [vmem:[#allocation5 + $0x148] sm:$0xff]  ;;  %v301_v62 = vld [vmem:[#allocation5 + $0x158] sm:$0xff]  ;;  %v326_v42 = vsub.s32 0, %v325_v41  ;;  %v330_v44 = vsub.s32 1, %v325_v41 }
  0x69   : > { %v626_v63 = vpack.c.bf16 %v296_v60, %v294_v59  ;;  %v628_v0 = vpack.c.bf16 %v301_v62, %v299_v61  ;;  %v298_v1 = vld [vmem:[#allocation5 + $0x140] sm:$0xff]  ;;  %v300_v2 = vld [vmem:[#allocation5 + $0x150] sm:$0xff]  ;;  %v303_v3 = vld [vmem:[#allocation5 + $0x168] sm:$0xff] }
  0x6a   : > { %603 = vmatpush1.bf16.msra.mxu0 %v602_v25  ;;  %671 = vmatpush1.bf16.msra.mxu1 %v602_v25  ;;  %v305_v4 = vld [vmem:[#allocation5 + $0x178] sm:$0xff]  ;;  %v630_v5 = vpack.c.bf16 %v300_v2, %v298_v1  ;;  %v302_v7 = vld [vmem:[#allocation5 + $0x160] sm:$0xff]  ;;  %v304_v8 = vld [vmem:[#allocation5 + $0x170] sm:$0xff] }
  0x6b   : > { %605 = vmatprep.subr.bf16.mxu0 %v604_v26  ;;  %656 = vmatprep.subr.bf16.mxu1 %v604_v26  ;;  %v632_v6 = vpack.c.bf16 %v305_v4, %v303_v3  ;;  %v307_v9 = vld [vmem:[#allocation5 + $0x188] sm:$0xff]  ;;  %v309_v10 = vld [vmem:[#allocation5 + $0x198] sm:$0xff]  ;;  %v634_v11 = vpack.c.bf16 %v304_v8, %v302_v7  ;;  %v306_v13 = vld [vmem:[#allocation5 + $0x180] sm:$0xff] }
  0x6c   : > { %v636_v12 = vpack.c.bf16 %v309_v10, %v307_v9  ;;  %v308_v14 = vld [vmem:[#allocation5 + $0x190] sm:$0xff]  ;;  %v311_v15 = vld [vmem:[#allocation5 + $0x1a8] sm:$0xff]  ;;  %v313_v16 = vld [vmem:[#allocation5 + $0x1b8] sm:$0xff] }
  0x6d   : > { %v638_v17 = vpack.c.bf16 %v308_v14, %v306_v13  ;;  %v640_v18 = vpack.c.bf16 %v313_v16, %v311_v15  ;;  %v310_v19 = vld [vmem:[#allocation5 + $0x1a0] sm:$0xff]  ;;  %v312_v20 = vld [vmem:[#allocation5 + $0x1b0] sm:$0xff]  ;;  %v315_v21 = vld [vmem:[#allocation5 + $0x1c8] sm:$0xff] }
  0x6e   : > { %607 = vmatpush1.bf16.msra.mxu0 %v606_v31  ;;  %672 = vmatpush1.bf16.msra.mxu1 %v606_v31  ;;  %v317_v22 = vld [vmem:[#allocation5 + $0x1d8] sm:$0xff]  ;;  %v642_v23 = vpack.c.bf16 %v312_v20, %v310_v19  ;;  %v314_v25 = vld [vmem:[#allocation5 + $0x1c0] sm:$0xff]  ;;  %v316_v26 = vld [vmem:[#allocation5 + $0x1d0] sm:$0xff] }
  0x6f   : > { %609 = vmatprep.subr.bf16.mxu0 %v608_v32  ;;  %657 = vmatprep.subr.bf16.mxu1 %v608_v32  ;;  %v644_v24 = vpack.c.bf16 %v317_v22, %v315_v21  ;;  %v319_v27 = vld [vmem:[#allocation5 + $0x1e8] sm:$0xff]  ;;  %v321_v28 = vld [vmem:[#allocation5 + $0x1f8] sm:$0xff]  ;;  %v646_v29 = vpack.c.bf16 %v316_v26, %v314_v25  ;;  %v318_v31 = vld [vmem:[#allocation5 + $0x1e0] sm:$0xff] }
  0x70   : > { %v648_v30 = vpack.c.bf16 %v321_v28, %v319_v27  ;;  %v320_v32 = vld [vmem:[#allocation5 + $0x1f0] sm:$0xff]  ;;  %v250_v34 = vld [vmem:[%s1114_s19] sm:$0xff]  ;;  %v253_v36 = vld [vmem:[%s1114_s19 + $0x18] sm:$0xff] }
  0x71   : > { %v650_v33 = vpack.c.bf16 %v320_v32, %v318_v31  ;;  %v254_v35 = vld [vmem:[%s1114_s19 + $0x20] sm:$0xff]  ;;  %v252_v38 = vld [vmem:[%s1114_s19 + $0x10] sm:$0xff] }
  0x72   : > { %611 = vmatpush1.bf16.msra.mxu0 %v610_v37  ;;  %673 = vmatpush1.bf16.msra.mxu1 %v610_v37  ;;  %v257_v37 = vld [vmem:[%s1114_s19 + $0x38] sm:$0xff]  ;;  %v322_v43 = vld [vmem:[%s1194_s2] sm:$0x3] }
  0x73   : > { %613 = vmatprep.subr.bf16.mxu0 %v612_v39  ;;  %658 = vmatprep.subr.bf16.mxu1 %v612_v39  ;;  %v256_v39 = vld [vmem:[%s1114_s19 + $0x30] sm:$0xff] }
  0x76   : > { %615 = vmatpush1.bf16.msra.mxu0 %v614_v45  ;;  %674 = vmatpush1.bf16.msra.mxu1 %v614_v45  ;;  %v327_v45 = vrot.slane %v322_v43, %v326_v42 }
  0x77   : > { %617 = vmatprep.subr.bf16.mxu0 %v616_v46  ;;  %659 = vmatprep.subr.bf16.mxu1 %v616_v46  ;;  %v331_v46 = vrot.slane %v322_v43, %v330_v44 }
  0x7a   : > { %619 = vmatpush1.bf16.msra.mxu0 %v618_v51  ;;  %675 = vmatpush1.bf16.msra.mxu1 %v618_v51 }
  0x7b   : > { %621 = vmatprep.subr.bf16.mxu0 %v620_v52  ;;  %660 = vmatprep.subr.bf16.mxu1 %v620_v52 }
  0x7e   : > { %623 = vmatpush1.bf16.msra.mxu0 %v622_v57  ;;  %676 = vmatpush1.bf16.msra.mxu1 %v622_v57 }
  0x7f   : > { %625 = vmatprep.subr.bf16.mxu0 %v624_v58  ;;  %661 = vmatprep.subr.bf16.mxu1 %v624_v58 }
  0x82   : > { %627 = vmatpush1.bf16.msra.mxu0 %v626_v63  ;;  %677 = vmatpush1.bf16.msra.mxu1 %v626_v63 }
  0x83   : > { %629 = vmatprep.subr.bf16.mxu0 %v628_v0  ;;  %662 = vmatprep.subr.bf16.mxu1 %v628_v0 }
  0x86   : > { %631 = vmatpush1.bf16.msra.mxu0 %v630_v5  ;;  %678 = vmatpush1.bf16.msra.mxu1 %v630_v5 }
  0x87   : > { %633 = vmatprep.subr.bf16.mxu0 %v632_v6  ;;  %663 = vmatprep.subr.bf16.mxu1 %v632_v6 }
  0x8a   : > { %635 = vmatpush1.bf16.msra.mxu0 %v634_v11  ;;  %679 = vmatpush1.bf16.msra.mxu1 %v634_v11 }
  0x8b   : > { %637 = vmatprep.subr.bf16.mxu0 %v636_v12  ;;  %664 = vmatprep.subr.bf16.mxu1 %v636_v12 }
  0x8e   : > { %639 = vmatpush1.bf16.msra.mxu0 %v638_v17  ;;  %680 = vmatpush1.bf16.msra.mxu1 %v638_v17 }
  0x8f   : > { %641 = vmatprep.subr.bf16.mxu0 %v640_v18  ;;  %665 = vmatprep.subr.bf16.mxu1 %v640_v18 }
  0x92   : > { %643 = vmatpush1.bf16.msra.mxu0 %v642_v23  ;;  %681 = vmatpush1.bf16.msra.mxu1 %v642_v23 }
  0x93   : > { %645 = vmatprep.subr.bf16.mxu0 %v644_v24  ;;  %666 = vmatprep.subr.bf16.mxu1 %v644_v24 }
  0x96   : > { %647 = vmatpush1.bf16.msra.mxu0 %v646_v29  ;;  %682 = vmatpush1.bf16.msra.mxu1 %v646_v29 }
  0x97   : > { %649 = vmatprep.subr.bf16.mxu0 %v648_v30  ;;  %667 = vmatprep.subr.bf16.mxu1 %v648_v30 }
  0x9a   : > { %651 = vmatpush1.bf16.msra.mxu0 %v650_v33  ;;  %683 = vmatpush1.bf16.msra.mxu1 %v650_v33 }
  0x9d   : > { %399 = vmatmul.mubr.f32.vlgmr.msra.gmra.mrb[0].mxu0 %v250_v34  ;;  %411 = vmatmul.mubr.f32.vlgmr.msra.gmra.mrb[0].mxu1 %v254_v35 }
  0x9e   : > { %404 = vmatprep.mubr.f32.mxu0 %v253_v36  ;;  %416 = vmatprep.mubr.f32.mxu1 %v257_v37 }
  0xa1   : > { %405 = vmatmul.mubr.f32.gmra.mrb[2].mxu0 %v252_v38  ;;  %417 = vmatmul.mubr.f32.gmra.mrb[2].mxu1 %v256_v39 }
 0x170   : > { %v400_v47 = vpop.f32.mrb[0].mxu0  ;;  %v412_v48 = vpop.f32.mrb[0].mxu1 }
 0x171   : > { %v401_v49 = vadd.f32 %v400_v47, %v327_v45  ;;  %v413_v50 = vadd.f32 %v412_v48, %v327_v45  ;;  %v402_v51 = vpop.f32.mrb[1].mxu0  ;;  %v414_v52 = vpop.f32.mrb[1].mxu1 }
 0x172   : > { %v403_v53 = vadd.f32 %v402_v51, %v331_v46  ;;  %v415_v54 = vadd.f32 %v414_v52, %v331_v46 }
 0x173   : > { %761 = vtanh.f32 %v401_v49 }
 0x174   : > { %763 = vtanh.f32 %v413_v50  ;;  %v406_v55 = vpop.f32.mrb[2].mxu0  ;;  %v418_v56 = vpop.f32.mrb[2].mxu1 }
 0x175   : > { %765 = vtanh.f32 %v403_v53  ;;  %v407_v57 = vadd.f32 %v406_v55, %v327_v45  ;;  %v419_v58 = vadd.f32 %v418_v56, %v327_v45  ;;  %v408_v59 = vpop.f32.mrb[3].mxu0  ;;  %v420_v60 = vpop.f32.mrb[3].mxu1 }
 0x176   : > { %767 = vtanh.f32 %v415_v54  ;;  %v409_v61 = vadd.f32 %v408_v59, %v331_v46  ;;  %v421_v62 = vadd.f32 %v420_v60, %v331_v46 }
 0x177   : > { %769 = vtanh.f32 %v407_v57 }
 0x178   : > { %771 = vtanh.f32 %v419_v58 }
 0x179   : > { %773 = vtanh.f32 %v409_v61 }
 0x17a   : > { %775 = vtanh.f32 %v421_v62 }
 0x17d   : > { %v762_v63 = vpop.eup %761 }
 0x17e   : > { %v764_v0 = vpop.eup %763  ;;  %431 = vst [vmem:[%s240_s24] sm:$0xff] %v762_v63 }
 0x17f   : > { %v766_v1 = vpop.eup %765  ;;  %435 = vst [vmem:[%s240_s24 + $0x20] sm:$0xff] %v764_v0 }
 0x180   : > { %v768_v2 = vpop.eup %767  ;;  %432 = vst [vmem:[%s240_s24 + $0x8] sm:$0xff] %v766_v1 }
 0x181   : > { %v770_v3 = vpop.eup %769  ;;  %436 = vst [vmem:[%s240_s24 + $0x28] sm:$0xff] %v768_v2 }
 0x182   : > { %v772_v4 = vpop.eup %771  ;;  %433 = vst [vmem:[%s240_s24 + $0x10] sm:$0xff] %v770_v3 }
 0x183   : > { %v774_v5 = vpop.eup %773  ;;  %437 = vst [vmem:[%s240_s24 + $0x30] sm:$0xff] %v772_v4 }
 0x184   : > { %v776_v6 = vpop.eup %775  ;;  %434 = vst [vmem:[%s240_s24 + $0x18] sm:$0xff] %v774_v5 }
 0x185   : > { %438 = vst [vmem:[%s240_s24 + $0x38] sm:$0xff] %v776_v6 }
 0x186   : > { %848 = shalt.err (!%p845_p5)
}
 0x187   : > { %s849_s6 = scalar_lea.hbm %s1141_s25, 1024  ;;  %s853_s19 = scalar_lea.hbm %s1195_s3, 2048 }
 0x188   : > { %p850_p9 = scmp.ne.s32.totalorder %s1141_s25, %s849_s6  ;;  %p854_p3 = scmp.lt.u32.totalorder %s1141_s25, %s1195_s3 }
 0x189   : > { %p855_p7 = scmp.lt.u32.totalorder %s853_s19, %s849_s6  ;;  %p857_p4 = scmp.lt.u32.totalorder %s849_s6, %s1141_s25 }
 0x18a   : > { %p851_p1 = pnand %p850_p9, %p1049_p10 }
 0x18b   : > { %p856_p13 = por %p855_p7, %p854_p3 }
 0x18c   : > { %p852_p2 = pneg %p851_p1 }
 0x18d   : > { %p858_p6 = por %p857_p4, %p856_p13 }
 0x18f   : > { %p859_p8 = pnand %p858_p6, %p852_p2 }
 0x191   : > { %862 = shalt.err (!%p859_p8)
}
 0x192   : > { %s928_s24 = smov 256   ;;  %s929_s10 = smov 16  }
 0x193   : > { %690 = dma.vmem_to_hbm [thread:$0]  (%p1049_p10), %s1143_s11, 1024, %s1141_s25, %s440_s15, %s928_s24, %s928_s24, %s929_s10  }
 0x194 PF: > { %s471_s9 = sand.u32 1, %s901_s12   ;;  %p1213_p12 = scmp.ne.s32.totalorder %s1203_s23, 0 }
 0x195   : > { %p1214_p11 = scmp.ge.s32.totalorder %s921_s17, 2  ;;  %s472_s18 = scalar_lea.sflag [#allocation4], %s471_s9 }
 0x197   : > { %p701_p0 = pnand %p1214_p11, %p1213_p12 }
 0x199   : > { %896 = dma.done.wait (!%p701_p0), %s472_s18, 1024  }
 0x19a   : > { %898 = vsyncadd (!%p701_p0), %s472_s18, 4294966272  ;;  %s20_s17 = sadd.s32 1, %s921_s17   ;;  %s1215_s12 = smov %s905_s13 }
 0x19b   : > { %p17_p5 = scmp.ge.s32.totalorder %s20_s17, 4   ;;  %s1216_s13 = smov %s909_s14 }
 0x19c   : > { %s1217_s14 = smov %s1058_s5  ;;  %s1218_s15 = smov %s917_s16 }
 0x19d   : > { %s1219_s16 = smov %s1221_s28  ;;  %19 = sbr.rel (!%p17_p5) target bundleno = 7 (0x7), region = 85 }
 0x1a4   :  { %477 = vsyncpa [#allocation3], 1 }
 0x1a5   :  { %479 = vsyncpa [#allocation3 + $0x1], 1 }
 0x1a6   :  { %480 = vsyncpa [#allocation6], 1 }
 0x1a7   :  { %481 = vsyncpa [#allocation4], 1 }
 0x1a8   :  { %483 = vsyncpa [#allocation4 + $0x1], 1 }

</bundles_post_ra>
